<compile_context>
chip_gen: v5e
topology: v5e:2x2
jax: 0.10.0
libtpu: 0.0.40
codegen_flags: <defaults>
</compile_context>

<pallas_src>
import functools

import jax
import jax.numpy as jnp
from jax.experimental import pallas as pl
from jax.experimental.pallas import tpu as pltpu

SUBLANE_ALIGN = 16  # bf16-friendly sublane granularity for the batch tile


def _round_up(n, m):
    return ((n + m - 1) // m) * m


def autoencoder2_kernel(x_ref,
                        w1_ref, b1_ref,   # encoder Linear(inputSize -> H0)
                        w2_ref, b2_ref,   # encoder Linear(H0 -> H1)
                        w3_ref, b3_ref,   # decoder Linear(H1 -> H0)
                        w4_ref, b4_ref,   # decoder Linear(H0 -> outputSize)
                        enc_ref, dec_ref):
    # x block: (Bt, in) any float dtype; weights bf16 (VMEM-resident); biases f32.
    x = x_ref[...].astype(jnp.bfloat16)

    # ---- encoder: Linear -> ReLU -> Linear (bf16 MXU inputs, f32 accumulate) ----
    h = jnp.dot(x, w1_ref[...], preferred_element_type=jnp.float32) + b1_ref[...]
    h = jnp.maximum(h, 0.0)                                   # ReLU(inplace=True)
    enc = jnp.dot(h.astype(jnp.bfloat16), w2_ref[...],
                  preferred_element_type=jnp.float32) + b2_ref[...]
    enc_ref[...] = enc.astype(enc_ref.dtype)                  # bf16 store

    # ---- decoder: Linear -> ReLU -> Linear -> Tanh ----
    d = jnp.dot(enc.astype(jnp.bfloat16), w3_ref[...],
                preferred_element_type=jnp.float32) + b3_ref[...]
    d = jnp.maximum(d, 0.0)
    d = jnp.dot(d.astype(jnp.bfloat16), w4_ref[...],
                preferred_element_type=jnp.float32) + b4_ref[...]
    dec_ref[...] = jnp.tanh(d).astype(dec_ref.dtype)          # bf16 store


def prepare_params(params):
    """One-time (init-path) prep: cast weights to bf16, biases to (1, N) f32.

    `params`: dict with w1..w4 shaped (in, out) and b1..b4 shaped (out,) or (1, out).
    """
    prep = {}
    for i in (1, 2, 3, 4):
        prep[f"w{i}"] = params[f"w{i}"].astype(jnp.bfloat16)
        prep[f"b{i}"] = params[f"b{i}"].astype(jnp.float32).reshape(1, -1)
    return prep


def my_autoencoder2(x, prep, *, block_rows=1024, min_batch_tiles=2):
    """Fused forward.  `prep` comes from prepare_params().

    Returns (encoder_output, decoder_output) in bf16, matching the PyTorch forward.
    """
    B, in_sz = x.shape
    h0 = prep["w1"].shape[1]          # NumHidden[0]
    h1 = prep["w2"].shape[1]          # NumHidden[1]
    out_sz = prep["w4"].shape[1]      # outputSize

    # Batch tile: multiple of 16 sublanes, capped at block_rows, and small
    # enough that the grid has >= min_batch_tiles steps whenever B allows
    # (so v7x can shard the "parallel" axis across its 2 TensorCores).
    bt = min(block_rows, _round_up(pl.cdiv(B, min_batch_tiles), SUBLANE_ALIGN))
    bt = max(bt, SUBLANE_ALIGN)
    b_p = _round_up(B, bt)
    grid = (b_p // bt,)

    # Only pad the batch if it doesn't divide the tile (zero rows are sliced
    # off afterwards); features are NOT padded -> no extra HBM pass over x.
    x_in = x if b_p == B else jnp.pad(x, ((0, b_p - B), (0, 0)))

    def batch_spec(cols):             # streamed (double-buffered) per batch tile
        return pl.BlockSpec((bt, cols), lambda i: (i, 0))

    def resident(shape):              # DMA'd once, stays in VMEM across the grid
        return pl.BlockSpec(shape, lambda i: (0, 0))

    w_bytes = sum(prep[f"w{i}"].size for i in (1, 2, 3, 4)) * 2
    b_bytes = sum(prep[f"b{i}"].size for i in (1, 2, 3, 4)) * 4
    cost = pl.CostEstimate(
        flops=2 * b_p * (in_sz * h0 + h0 * h1 + h1 * h0 + h0 * out_sz),
        transcendentals=b_p * out_sz,                      # tanh
        bytes_accessed=(x_in.size * x_in.dtype.itemsize
                        + w_bytes + b_bytes
                        + b_p * (h1 + out_sz) * 2))        # bf16 outputs

    enc, dec = pl.pallas_call(
        autoencoder2_kernel,
        out_shape=(
            jax.ShapeDtypeStruct((b_p, h1), jnp.bfloat16),
            jax.ShapeDtypeStruct((b_p, out_sz), jnp.bfloat16),
        ),
        grid=grid,
        in_specs=[
            batch_spec(in_sz),
            resident((in_sz, h0)), resident((1, h0)),
            resident((h0, h1)), resident((1, h1)),
            resident((h1, h0)), resident((1, h0)),
            resident((h0, out_sz)), resident((1, out_sz)),
        ],
        out_specs=(batch_spec(h1), batch_spec(out_sz)),
        compiler_params=pltpu.CompilerParams(
            dimension_semantics=("parallel",),   # v7x: 2 TCs split the batch tiles
        ),
        cost_estimate=cost,
    )(x_in, prep["w1"], prep["b1"], prep["w2"], prep["b2"],
      prep["w3"], prep["b3"], prep["w4"], prep["b4"])

    if b_p != B:                       # only slice when the batch was padded
        enc, dec = enc[:B], dec[:B]
    return enc, dec


def init_linear(key, fan_in, fan_out):
    # PyTorch nn.Linear default init: U(-1/sqrt(fan_in), 1/sqrt(fan_in))
    kw, kb = jax.random.split(key)
    bound = 1.0 / jnp.sqrt(jnp.float32(fan_in))
    w = jax.random.uniform(kw, (fan_in, fan_out), jnp.float32, -bound, bound)
    b = jax.random.uniform(kb, (1, fan_out), jnp.float32, -bound, bound)
    return w, b


if __name__ == "__main__":
    # Small shapes consistent with the module's forward:
    # myAutoencoder2(NumHidden=[32, 16], inputSize=32, outputSize=32)
    batch, input_size, out_size = 32, 32, 32
    num_hidden = (32, 16)

    key = jax.random.PRNGKey(0)
    kx, k1, k2, k3, k4 = jax.random.split(key, 5)

    x = jax.random.normal(kx, (batch, input_size), jnp.float32)

    w1, b1 = init_linear(k1, input_size, num_hidden[0])
    w2, b2 = init_linear(k2, num_hidden[0], num_hidden[1])
    w3, b3 = init_linear(k3, num_hidden[1], num_hidden[0])
    w4, b4 = init_linear(k4, num_hidden[0], out_size)
    params = dict(w1=w1, b1=b1, w2=w2, b2=b2, w3=w3, b3=b3, w4=w4, b4=b4)

    # One-time weight prep (outside the per-call path), then a jitted forward.
    prep = prepare_params(params)
    fwd = jax.jit(functools.partial(my_autoencoder2, prep=prep))

    # batch=32 -> bt=16, grid=(2,): exercises the multi-tile "parallel" path.
    enc, dec = fwd(x)
    jax.block_until_ready((enc, dec))

    # Pure-JAX reference with matching bf16 matmul inputs / f32 accumulation.
    def mm(a, w):
        return jnp.dot(a.astype(jnp.bfloat16), w.astype(jnp.bfloat16),
                       preferred_element_type=jnp.float32)

    h = jnp.maximum(mm(x, w1) + b1, 0.0)
    enc_ref = mm(h, w2) + b2
    d = jnp.maximum(mm(enc_ref, w3) + b3, 0.0)
    dec_ref = jnp.tanh(mm(d, w4) + b4)

    assert enc.shape == (batch, num_hidden[1]) and dec.shape == (batch, out_size)
    assert enc.dtype == jnp.bfloat16 and dec.dtype == jnp.bfloat16
    # Outputs are stored in bf16, so compare with a bf16-appropriate tolerance.
    assert jnp.allclose(enc.astype(jnp.float32), enc_ref, atol=3e-2, rtol=3e-2), \
        "encoder mismatch"
    assert jnp.allclose(dec.astype(jnp.float32), dec_ref, atol=3e-2, rtol=3e-2), \
        "decoder mismatch"

    print("KERNEL_OK")
</pallas_src>

<mosaic_0001>
module attributes {stable_mosaic.version = 11 : i64} {
  func.func @autoencoder2_kernel(%arg0: i32, %arg1: memref<16x32xf32, #tpu.memory_space<vmem>>, %arg2: memref<32x32xbf16, #tpu.memory_space<vmem>>, %arg3: memref<1x32xf32, #tpu.memory_space<vmem>>, %arg4: memref<32x16xbf16, #tpu.memory_space<vmem>>, %arg5: memref<1x16xf32, #tpu.memory_space<vmem>>, %arg6: memref<16x32xbf16, #tpu.memory_space<vmem>>, %arg7: memref<1x32xf32, #tpu.memory_space<vmem>>, %arg8: memref<32x32xbf16, #tpu.memory_space<vmem>>, %arg9: memref<1x32xf32, #tpu.memory_space<vmem>>, %arg10: memref<16x16xbf16, #tpu.memory_space<vmem>>, %arg11: memref<16x32xbf16, #tpu.memory_space<vmem>>) attributes {dimension_semantics = [#tpu.dimension_semantics<parallel>], iteration_bounds = array<i64: 2>, scalar_prefetch = 0 : i64, scratch_operands = 0 : i64, tpu.core_type = #tpu.core_type<tc>, window_params = [{transform_indices = @transform_0, window_bounds = array<i64: 16, 32>}, {pipeline_mode = #tpu.pipeline_mode<synchronous>, transform_indices = @transform_1, window_bounds = array<i64: 32, 32>}, {pipeline_mode = #tpu.pipeline_mode<synchronous>, transform_indices = @transform_2, window_bounds = array<i64: 1, 32>}, {pipeline_mode = #tpu.pipeline_mode<synchronous>, transform_indices = @transform_3, window_bounds = array<i64: 32, 16>}, {pipeline_mode = #tpu.pipeline_mode<synchronous>, transform_indices = @transform_4, window_bounds = array<i64: 1, 16>}, {pipeline_mode = #tpu.pipeline_mode<synchronous>, transform_indices = @transform_5, window_bounds = array<i64: 16, 32>}, {pipeline_mode = #tpu.pipeline_mode<synchronous>, transform_indices = @transform_6, window_bounds = array<i64: 1, 32>}, {pipeline_mode = #tpu.pipeline_mode<synchronous>, transform_indices = @transform_7, window_bounds = array<i64: 32, 32>}, {pipeline_mode = #tpu.pipeline_mode<synchronous>, transform_indices = @transform_8, window_bounds = array<i64: 1, 32>}, {transform_indices = @transform_9, window_bounds = array<i64: 16, 16>}, {transform_indices = @transform_10, window_bounds = array<i64: 16, 32>}]} {
    %c0 = arith.constant 0 : index
    %c0_0 = arith.constant 0 : index
    %0 = vector.load %arg1[%c0, %c0_0] : memref<16x32xf32, #tpu.memory_space<vmem>>, vector<16x32xf32>
    %1 = arith.truncf %0 : vector<16x32xf32> to vector<16x32xbf16>
    %c0_1 = arith.constant 0 : index
    %c0_2 = arith.constant 0 : index
    %2 = vector.load %arg2[%c0_1, %c0_2] : memref<32x32xbf16, #tpu.memory_space<vmem>>, vector<32x32xbf16>
    %cst = arith.constant dense<0.000000e+00> : vector<16x32xf32>
    %3 = tpu.matmul %1, %2, %cst {dimension_numbers = #tpu.dot_dimension_numbers<[1], [0], [0], [1], [0, 0, 1, 1], [], []>} : vector<16x32xbf16>, vector<32x32xbf16>, vector<16x32xf32> -> vector<16x32xf32>
    %c0_3 = arith.constant 0 : index
    %c0_4 = arith.constant 0 : index
    %4 = vector.load %arg3[%c0_3, %c0_4] : memref<1x32xf32, #tpu.memory_space<vmem>>, vector<1x32xf32>
    %5 = vector.broadcast %4 : vector<1x32xf32> to vector<16x32xf32>
    %6 = arith.addf %3, %5 : vector<16x32xf32>
    %cst_5 = arith.constant 0.000000e+00 : f32
    %7 = vector.broadcast %cst_5 : f32 to vector<16x32xf32>
    %8 = arith.maximumf %6, %7 : vector<16x32xf32>
    %9 = arith.truncf %8 : vector<16x32xf32> to vector<16x32xbf16>
    %c0_6 = arith.constant 0 : index
    %c0_7 = arith.constant 0 : index
    %10 = vector.load %arg4[%c0_6, %c0_7] : memref<32x16xbf16, #tpu.memory_space<vmem>>, vector<32x16xbf16>
    %cst_8 = arith.constant dense<0.000000e+00> : vector<16x16xf32>
    %11 = tpu.matmul %9, %10, %cst_8 {dimension_numbers = #tpu.dot_dimension_numbers<[1], [0], [0], [1], [0, 0, 1, 1], [], []>} : vector<16x32xbf16>, vector<32x16xbf16>, vector<16x16xf32> -> vector<16x16xf32>
    %c0_9 = arith.constant 0 : index
    %c0_10 = arith.constant 0 : index
    %12 = vector.load %arg5[%c0_9, %c0_10] : memref<1x16xf32, #tpu.memory_space<vmem>>, vector<1x16xf32>
    %13 = vector.broadcast %12 : vector<1x16xf32> to vector<16x16xf32>
    %14 = arith.addf %11, %13 : vector<16x16xf32>
    %15 = arith.truncf %14 : vector<16x16xf32> to vector<16x16xbf16>
    %c0_11 = arith.constant 0 : index
    %c0_12 = arith.constant 0 : index
    %16 = vector.load %arg10[%c0_11, %c0_12] : memref<16x16xbf16, #tpu.memory_space<vmem>>, vector<16x16xbf16>
    tpu.vector_store %arg10[%c0_11, %c0_12], %15 {strides = array<i32>} : memref<16x16xbf16, #tpu.memory_space<vmem>>, vector<16x16xbf16>,
    %17 = arith.truncf %14 : vector<16x16xf32> to vector<16x16xbf16>
    %c0_13 = arith.constant 0 : index
    %c0_14 = arith.constant 0 : index
    %18 = vector.load %arg6[%c0_13, %c0_14] : memref<16x32xbf16, #tpu.memory_space<vmem>>, vector<16x32xbf16>
    %cst_15 = arith.constant dense<0.000000e+00> : vector<16x32xf32>
    %19 = tpu.matmul %17, %18, %cst_15 {dimension_numbers = #tpu.dot_dimension_numbers<[1], [0], [0], [1], [0, 0, 1, 1], [], []>} : vector<16x16xbf16>, vector<16x32xbf16>, vector<16x32xf32> -> vector<16x32xf32>
    %c0_16 = arith.constant 0 : index
    %c0_17 = arith.constant 0 : index
    %20 = vector.load %arg7[%c0_16, %c0_17] : memref<1x32xf32, #tpu.memory_space<vmem>>, vector<1x32xf32>
    %21 = vector.broadcast %20 : vector<1x32xf32> to vector<16x32xf32>
    %22 = arith.addf %19, %21 : vector<16x32xf32>
    %cst_18 = arith.constant 0.000000e+00 : f32
    %23 = vector.broadcast %cst_18 : f32 to vector<16x32xf32>
    %24 = arith.maximumf %22, %23 : vector<16x32xf32>
    %25 = arith.truncf %24 : vector<16x32xf32> to vector<16x32xbf16>
    %c0_19 = arith.constant 0 : index
    %c0_20 = arith.constant 0 : index
    %26 = vector.load %arg8[%c0_19, %c0_20] : memref<32x32xbf16, #tpu.memory_space<vmem>>, vector<32x32xbf16>
    %cst_21 = arith.constant dense<0.000000e+00> : vector<16x32xf32>
    %27 = tpu.matmul %25, %26, %cst_21 {dimension_numbers = #tpu.dot_dimension_numbers<[1], [0], [0], [1], [0, 0, 1, 1], [], []>} : vector<16x32xbf16>, vector<32x32xbf16>, vector<16x32xf32> -> vector<16x32xf32>
    %c0_22 = arith.constant 0 : index
    %c0_23 = arith.constant 0 : index
    %28 = vector.load %arg9[%c0_22, %c0_23] : memref<1x32xf32, #tpu.memory_space<vmem>>, vector<1x32xf32>
    %29 = vector.broadcast %28 : vector<1x32xf32> to vector<16x32xf32>
    %30 = arith.addf %27, %29 : vector<16x32xf32>
    %31 = math.tanh %30 : vector<16x32xf32>
    %32 = arith.truncf %31 : vector<16x32xf32> to vector<16x32xbf16>
    %c0_24 = arith.constant 0 : index
    %c0_25 = arith.constant 0 : index
    %33 = vector.load %arg11[%c0_24, %c0_25] : memref<16x32xbf16, #tpu.memory_space<vmem>>, vector<16x32xbf16>
    tpu.vector_store %arg11[%c0_24, %c0_25], %32 {strides = array<i32>} : memref<16x32xbf16, #tpu.memory_space<vmem>>, vector<16x32xbf16>,
    return
  }
  func.func @transform_0(%arg0: i32) -> (i32, i32) {
    %c0_i32 = arith.constant 0 : i32
    %c0_i32_0 = arith.constant 0 : i32
    return %arg0, %c0_i32 : i32, i32
  }
  func.func @transform_1(%arg0: i32) -> (i32, i32) {
    %c0_i32 = arith.constant 0 : i32
    %c0_i32_0 = arith.constant 0 : i32
    %c0_i32_1 = arith.constant 0 : i32
    return %c0_i32, %c0_i32_0 : i32, i32
  }
  func.func @transform_2(%arg0: i32) -> (i32, i32) {
    %c0_i32 = arith.constant 0 : i32
    %c0_i32_0 = arith.constant 0 : i32
    %c0_i32_1 = arith.constant 0 : i32
    return %c0_i32, %c0_i32_0 : i32, i32
  }
  func.func @transform_3(%arg0: i32) -> (i32, i32) {
    %c0_i32 = arith.constant 0 : i32
    %c0_i32_0 = arith.constant 0 : i32
    %c0_i32_1 = arith.constant 0 : i32
    return %c0_i32, %c0_i32_0 : i32, i32
  }
  func.func @transform_4(%arg0: i32) -> (i32, i32) {
    %c0_i32 = arith.constant 0 : i32
    %c0_i32_0 = arith.constant 0 : i32
    %c0_i32_1 = arith.constant 0 : i32
    return %c0_i32, %c0_i32_0 : i32, i32
  }
  func.func @transform_5(%arg0: i32) -> (i32, i32) {
    %c0_i32 = arith.constant 0 : i32
    %c0_i32_0 = arith.constant 0 : i32
    %c0_i32_1 = arith.constant 0 : i32
    return %c0_i32, %c0_i32_0 : i32, i32
  }
  func.func @transform_6(%arg0: i32) -> (i32, i32) {
    %c0_i32 = arith.constant 0 : i32
    %c0_i32_0 = arith.constant 0 : i32
    %c0_i32_1 = arith.constant 0 : i32
    return %c0_i32, %c0_i32_0 : i32, i32
  }
  func.func @transform_7(%arg0: i32) -> (i32, i32) {
    %c0_i32 = arith.constant 0 : i32
    %c0_i32_0 = arith.constant 0 : i32
    %c0_i32_1 = arith.constant 0 : i32
    return %c0_i32, %c0_i32_0 : i32, i32
  }
  func.func @transform_8(%arg0: i32) -> (i32, i32) {
    %c0_i32 = arith.constant 0 : i32
    %c0_i32_0 = arith.constant 0 : i32
    %c0_i32_1 = arith.constant 0 : i32
    return %c0_i32, %c0_i32_0 : i32, i32
  }
  func.func @transform_9(%arg0: i32) -> (i32, i32) {
    %c0_i32 = arith.constant 0 : i32
    %c0_i32_0 = arith.constant 0 : i32
    return %arg0, %c0_i32 : i32, i32
  }
  func.func @transform_10(%arg0: i32) -> (i32, i32) {
    %c0_i32 = arith.constant 0 : i32
    %c0_i32_0 = arith.constant 0 : i32
    return %arg0, %c0_i32 : i32, i32
  }
}

</mosaic_0001>

<bundles_post_ra>
// kernel: my_autoencoder2.1
= control target key start
LH: loop header
LB: loop body
LE: loop exit
PB: predicated region body
PF: predicated region fallthrough
CT: control target
= control target key end

     0   :  { %s1514_s0 = inlined_call_operand.hbm [shape: f32[32,32], index: 0, kind: input, shape index: {}]   ;;  %s1515_s1 = inlined_call_operand.hbm [shape: bf16[32,32], index: 1, kind: input, shape index: {}]   ;;  %s1516_s2 = inlined_call_operand.hbm [shape: f32[1,32], index: 2, kind: input, shape index: {}]   ;;  %s1517_s3 = inlined_call_operand.hbm [shape: bf16[32,16], index: 3, kind: input, shape index: {}]   ;;  %s1518_s4 = inlined_call_operand.vmem [shape: f32[1,16], index: 4, kind: input, shape index: {}]   ;;  %s1519_s5 = inlined_call_operand.hbm [shape: bf16[16,32], index: 5, kind: input, shape index: {}]   ;;  %s1520_s6 = inlined_call_operand.vmem [shape: f32[1,32], index: 6, kind: input, shape index: {}]   ;;  %s1521_s7 = inlined_call_operand.hbm [shape: bf16[32,32], index: 7, kind: input, shape index: {}]   ;;  %s1522_s8 = inlined_call_operand.vmem [shape: f32[1,32], index: 8, kind: input, shape index: {}]   ;;  %s1523_s9 = inlined_call_operand.vmem [shape: bf16[32,16], index: 9, kind: output, shape index: {0}]   ;;  %s1524_s10 = inlined_call_operand.hbm [shape: bf16[32,32], index: 10, kind: output, shape index: {1}]  }
   0x1   :  { %1525 = sst [smem:[#allocation19_spill]] %s1515_s1 }
   0x2   :  { %1526 = sst [smem:[#allocation20_spill]] %s1516_s2 }
   0x3   :  { %1527 = sst [smem:[#allocation21_spill]] %s1517_s3 }
   0x4   :  { %1528 = sst [smem:[#allocation22_spill]] %s1519_s5 }
   0x5   :  { %1529 = sst [smem:[#allocation23_spill]] %s1521_s7 }
   0x6   :  { %16 = vsyncpa [#allocation3], 0 }
   0x7   :  { %18 = vsyncpa [#allocation3 + $0x1], 0 }
   0x8   :  { %19 = vsyncpa [#allocation6], 0 }
   0x9   :  { %20 = vsyncpa [#allocation9], 0 }
   0xa   :  { %21 = vsyncpa [#allocation12], 0 }
   0xb   :  { %22 = vsyncpa [#allocation4], 0 }
   0xc   :  { %24 = vsyncpa [#allocation4 + $0x1], 0  ;;  %s1321_s13 = smov 0   ;;  %s1323_s14 = smov 0  }
   0xd   :  { %s1325_s15 = smov 0   ;;  %s1327_s16 = smov 0  }
   0xe LB: > { %s1530_s1 = sld [smem:[#allocation19_spill]]  ;;  %s1345_s20 = sadd.s32 4294967295, %s1253_s16   ;;  %s1253_s16 = sphi %s1327_s16, %s1546_s16   ;;  %s1249_s15 = sphi %s1325_s15, %s1545_s15   ;;  %s1245_s14 = sphi %s1323_s14, %s1544_s14   ;;  %s1241_s13 = sphi %s1321_s13, %s1543_s13  }
   0xf   : > { %p818_p0 = scmp.ge.s32.totalorder %s1253_s16, 1  ;;  %p51_p1 = scmp.eq.s32.totalorder %s1345_s20, 0 }
  0x10   : > { %p281_p2 = scmp.lt.s32.totalorder %s1253_s16, 3  ;;  %s1255_s22 = smov [#allocation5]  }
  0x11   : > { %s294_s23 = sshll.u32 %s1255_s22, 4  ;;  %s1532_s3 = sld [smem:[#allocation21_spill]]  ;;  %s295_s23 = int_to_ptr.vmem [resolvable:$true] %s294_s23 }
  0x12   : > { %p1350_p3 = pnand %p818_p0, %p281_p2  ;;  %s1534_s2 = sld [smem:[#allocation20_spill]] }
  0x13   : > { %s1256_s11 = smov [#allocation8]   ;;  %s1257_s17 = smov 64  }
  0x14   : > { %s292_s19 = sshll.u32 %s1530_s1, 4  ;;  %p908_p4 = pneg %p1350_p3  ;;  %s293_s19 = int_to_ptr.hbm [resolvable:$true] %s292_s19 }
  0x15   : > { %s320_s12 = sshll.u32 %s1256_s11, 4  ;;  %s1258_s18 = smov 4   ;;  %s321_s12 = int_to_ptr.vmem [resolvable:$true] %s320_s12 }
  0x16   : > { %p1362_p6 = pnand %p908_p4, %p51_p1  ;;  %s1535_s5 = sld [smem:[#allocation22_spill]] }
  0x17   : > { %s318_s26 = sshll.u32 %s1532_s3, 4  ;;  %s1259_s1 = smov [#allocation7]   ;;  %s319_s26 = int_to_ptr.hbm [resolvable:$true] %s318_s26 }
  0x18   : > { %s307_s30 = sshll.u32 %s1534_s2, 4  ;;  %s309_s28 = sshll.u32 %s1259_s1, 4  ;;  %s308_s30 = int_to_ptr.hbm [resolvable:$true] %s307_s30  ;;  %s310_s28 = int_to_ptr.vmem [resolvable:$true] %s309_s28 }
  0x19   : > { %911 = dma.hbm_to_vmem [thread:$0]  (!%p1362_p6), %s293_s19, 256, %s295_s23, [#allocation6], %s1257_s17, %s1257_s17, %s1258_s18  }
  0x1a   : > { %917 = dma.hbm_to_vmem [thread:$0]  (!%p1362_p6), %s319_s26, 256, %s321_s12, [#allocation9], %s1257_s17, %s1257_s17, %s1258_s18  }
  0x1b   : > { %914 = dma.hbm_to_vmem [thread:$0]  (!%p1362_p6), %s308_s30, 16, %s310_s28, [#allocation6]  }
  0x1c   : > { %s335_s25 = sshll.u32 %s1535_s5, 4  ;;  %s1260_s19 = smov [#allocation10]   ;;  %s336_s25 = int_to_ptr.hbm [resolvable:$true] %s335_s25 }
  0x1d   : > { %s337_s23 = sshll.u32 %s1260_s19, 4  ;;  %s1536_s7 = sld [smem:[#allocation23_spill]]  ;;  %s338_s23 = int_to_ptr.vmem [resolvable:$true] %s337_s23 }
  0x1e   : > { %920 = dma.hbm_to_vmem [thread:$0]  (!%p1362_p6), %s336_s25, 128, %s338_s23, [#allocation9], %s1257_s17, %s1257_s17, %s1258_s18  }
  0x1f   : > { %s1261_s1 = smov [#allocation11]   ;;  %s817_s30 = sadd.s32 4294967294, %s1253_s16  }
  0x20   : > { %s354_s12 = sshll.u32 %s1261_s1, 4  ;;  %s1387_s22 = sadd.s32 1, %s1253_s16   ;;  %s355_s12 = int_to_ptr.vmem [resolvable:$true] %s354_s12 }
  0x21   : > { %s37_s24 = sadd.s32 1, %s1249_s15  ;;  %s34_s28 = ssub.s32 %s1253_s16, %s1387_s22 }
  0x22   : > { %p44_p7 = scmp.ne.s32.totalorder %s1249_s15, %s1245_s14  ;;  %p35_p8 = scmp.eq.s32.totalorder %s34_s28, 0 }
  0x23   : > { %s352_s11 = sshll.u32 %s1536_s7, 4  ;;  %p45_p9 = scmp.eq.s32.totalorder %s1253_s16, 0  ;;  %s353_s11 = int_to_ptr.hbm [resolvable:$true] %s352_s11 }
  0x24   : > { %923 = dma.hbm_to_vmem [thread:$0]  (!%p1362_p6), %s353_s11, 256, %s355_s12, [#allocation12], %s1257_s17, %s1257_s17, %s1258_s18  }
  0x25   : > { %p50_p10 = scmp.ne.s32.totalorder %s1245_s14, %s1241_s13  ;;  %p268_p11 = scmp.eq.s32.totalorder %s1345_s20, 1 }
  0x26   : > { %s1399_s25 = scalar_select %p35_p8, %s1249_s15, %s37_s24  }
  0x27   : > { %p1401_p12 = por %p45_p9, %p44_p7  ;;  %p1407_p13 = por %p51_p1, %p50_p10 }
  0x28   : > { %p1411_p0 = por %p268_p11, %p44_p7  ;;  %p274_p2 = scmp.eq.s32.totalorder %s817_s30, 1 }
  0x29   : > { %p937_p4 = scmp.lt.s32.totalorder %s1253_s16, 2  ;;  %s371_s18 = sand.u32 1, %s1249_s15  }
  0x2a   : > { %p1417_p6 = por %p274_p2, %p50_p10  ;;  %s825_s26 = sshll.u32 %s371_s18, 4 }
  0x2b   : > { %s875_s29 = sshll.u32 %s1253_s16, 4  ;;  %s375_s28 = scalar_lea.vmem [#allocation2], %s825_s26 }
  0x2c   : > { %s380_s12 = scalar_lea.hbm %s1514_s0, %s875_s29  ;;  %s383_s2 = sshll.u32 %s375_s28, 4  ;;  %s384_s2 = int_to_ptr.vmem [resolvable:$true] %s383_s2 }
  0x2d   : > { %s381_s24 = sshll.u32 %s380_s12, 4  ;;  %p1427_p7 = pnand %p937_p4, %p1401_p12  ;;  %s382_s24 = int_to_ptr.hbm [resolvable:$true] %s381_s24 }
  0x2e   : > { %s372_s3 = scalar_lea.sflag [#allocation3], %s371_s18  ;;  %s1145_s5 = sshra.s32 %s382_s24, 4  ;;  %s1146_s5 = int_to_ptr.hbm [resolvable:$true] %s1145_s5 }
  0x2f   : > { %s1147_s7 = scalar_lea.hbm %s1146_s5, 16  ;;  %p1149_p9 = pneg %p1427_p7 }
  0x30   : > { %p1148_p8 = scmp.ne.s32.totalorder %s1146_s5, %s1147_s7  ;;  %s1152_s11 = scalar_lea.hbm %s1514_s0, 32 }
  0x31   : > { %p1153_p12 = scmp.lt.s32.totalorder %s1146_s5, %s1514_s0  ;;  %p1154_p2 = scmp.lt.s32.totalorder %s1152_s11, %s1147_s7 }
  0x32   : > { %p1150_p10 = pnand %p1149_p9, %p1148_p8 }
  0x33   : > { %p1155_p4 = por %p1154_p2, %p1153_p12 }
  0x34   : > { %p1151_p11 = pneg %p1150_p10 }
  0x36   : > { %p1156_p5 = pnand %p1155_p4, %p1151_p11 }
  0x38   : > { %1159 = shalt.err (!%p1156_p5)
}
  0x39   : > { %s1262_s18 = smov 128   ;;  %s1263_s12 = smov 8  }
  0x3a   : > { %927 = dma.hbm_to_vmem [thread:$0]  (!%p1427_p7), %s382_s24, 256, %s384_s2, %s372_s3, %s1262_s18, %s1262_s18, %s1263_s12  }
  0x3b   : > { %395 = sbr.rel (%p1350_p3) target bundleno = 662 (0x296), region = 56  ;;  %s1444_s28 = sand.u32 (!%p1350_p3), 1, %s1245_s14  }
  0x3c   : > { %s829_s29 = sshll.u32 (!%p1350_p3), %s1444_s28, 4  ;;  %s398_s5 = scalar_lea.sflag (!%p1350_p3), [#allocation3], %s1444_s28 }
  0x3d   : > { %s401_s7 = scalar_lea.vmem (!%p1350_p3), [#allocation2], %s829_s29 }
  0x40   : > { %1220 = dma.done.wait (%p1407_p13), %s398_s5, 256  }
  0x41   : > { %1222 = vsyncadd (%p1407_p13), %s398_s5, 4294967040 }
  0x42   : > { %1224 = dma.done.wait (%p51_p1), [#allocation6], 272  }
  0x43   : > { %1226 = vsyncadd (%p51_p1), [#allocation6], 4294967024 }
  0x44   : > { %1228 = dma.done.wait (%p51_p1), [#allocation9], 384  }
  0x45   : > { %1230 = vsyncadd (%p51_p1), [#allocation9], 4294966912 }
  0x46   : > { %1232 = dma.done.wait (%p51_p1), [#allocation12], 256  }
  0x47   : > { %1234 = vsyncadd (%p51_p1), [#allocation12], 4294967040  ;;  %v877_v0 = vld [vmem:[#allocation5 + $0x8] sm:$0xff]  ;;  %v876_v1 = vld [vmem:[#allocation5] sm:$0xff]  ;;  %vm501_vm0 = vcmask 261120   ;;  %s836_s2 = sshll.u32 %s1345_s20, 1 }
  0x48   : > { %v478_v2 = vld [vmem:[%s401_s7] sm:$0xff]  ;;  %v479_v3 = vld [vmem:[%s401_s7 + $0x8] sm:$0xff]  ;;  %511 = vmatpush.bf16.msra.mxu0 %v877_v0  ;;  %p471_p1 = scmp.lt.s32.totalorder %s836_s2, 3  ;;  %vm561_vm1 = vcmask 125952   ;;  %vm581_vm2 = vcmask 130048   ;;  %s835_s12 = sshll.u32 %s1444_s28, 3 }
  0x49   : > { %v480_v4 = vpack.c.bf16 %v479_v3, %v478_v2  ;;  %v879_v5 = vld [vmem:[#allocation8 + $0x8] sm:$0xff]  ;;  %v878_v6 = vld [vmem:[#allocation8] sm:$0xff]  ;;  %v987_v8 = vld [vmem:[#allocation7] ss:$0 sm:$0xff]  ;;  %s883_s29 = sshll.u32 %s1345_s20, 3  ;;  %vm643_vm3 = vcmask 257024  }
  0x4a   : > { %551 = vmatpush.bf16.msra.mxu1 %v879_v5  ;;  %v880_v15 = vld [vmem:[#allocation10] sm:$0xff]  ;;  %s1548_s2 = smov (!%p471_p1, %s836_s2), 3  ;;  %v988_v16 = vld [vmem:[%s1518_s4] ss:$0 sm:$0xff]  ;;  %v882_v26 = vld [vmem:[#allocation11 + $0x8] sm:$0xff]  ;;  %s468_s3 = scalar_lea.vmem [#allocation13], %s835_s12 }
  0x4b   : > { %592 = vmatpush.bf16.msra.mxu2 %v880_v15  ;;  %s837_s27 = sshll.u32 %s1548_s2, 2  ;;  %631 = vmatpush.bf16.msra.mxu3 %v882_v26  ;;  %v881_v27 = vld [vmem:[#allocation11] sm:$0xff]  ;;  %v989_v29 = vld [vmem:[%s1520_s6] ss:$0 sm:$0xff]  ;;  %s667_s2 = scalar_lea.hbm %s1524_s10, %s883_s29 }
  0x4c   : > { %512 = vmatpush.bf16.msra.mxu0 %v876_v1  ;;  %s474_s26 = scalar_lea.vmem %s1523_s9, %s837_s27  ;;  %v990_v36 = vld [vmem:[%s1522_s8] ss:$0 sm:$0xff]  ;;  %s668_s21 = sshll.u32 %s468_s3, 4  ;;  %s669_s21 = int_to_ptr.vmem [resolvable:$true] %s668_s21 }
  0x4d   : > { %s670_s27 = sshll.u32 %s667_s2, 4  ;;  %s652_s20 = scalar_lea.sflag [#allocation4], %s1444_s28  ;;  %s671_s27 = int_to_ptr.hbm [resolvable:$true] %s670_s27 }
  0x4e   : > { %552 = vmatpush.bf16.msra.mxu1 %v878_v6  ;;  %s1189_s24 = sshra.s32 %s671_s27, 4  ;;  %s1195_s1 = scalar_lea.hbm %s1524_s10, 16  ;;  %s1190_s24 = int_to_ptr.hbm [resolvable:$true] %s1189_s24 }
  0x4f   : > { %846 = vmatmul.msk.bf16.vlgmr.msra.gmra.mxu0 %vm501_vm0, %v480_v4  ;;  %632 = vmatpush.bf16.msra.mxu3 %v881_v27  ;;  %s1191_s30 = scalar_lea.hbm %s1190_s24, 8  ;;  %p1196_p7 = scmp.lt.s32.totalorder %s1190_s24, %s1524_s10 }
  0x50   : > { %p1192_p3 = scmp.ne.s32.totalorder %s1190_s24, %s1191_s30  ;;  %p1197_p8 = scmp.lt.s32.totalorder %s1195_s1, %s1191_s30 }
  0x52   : > { %p1193_p5 = pnand %p1192_p3, %p1411_p0  ;;  %p1198_p9 = por %p1197_p8, %p1196_p7 }
  0x54   : > { %p1194_p13 = pneg %p1193_p5 }
  0x56   : > { %p1199_p10 = pnand %p1198_p9, %p1194_p13 }
  0xcc   : > { %v514_v7 = vpop.f32.mrf.mxu0 }
  0xcd   : > { %v515_v9 = vadd.f32 %v987_v8, %v514_v7 }
  0xcf   : > { %v519_v12 = vmax.f32 %v515_v9, 0.0 }
  0xd4   : > { %v516_v10 = vpop.f32.mrf.mxu0 }
  0xd5   : > { %v517_v11 = vadd.f32 %v987_v8, %v516_v10 }
  0xd7   : > { %v520_v13 = vmax.f32 %v517_v11, 0.0 }
  0xd9   : > { %v521_v14 = vpack.c.bf16 %v520_v13, %v519_v12 }
  0xdb   : > { %855 = vmatmul.msk.bf16.vlgmr.msra.gmra.mxu1 %vm501_vm0, %v521_v14 }
 0x158   : > { %v554_v17 = vpop.f32.mrf.mxu1 }
 0x159   : > { %v555_v18 = vadd.f32 %v988_v16, %v554_v17 }
 0x15b   : > { %v559_v19 = vpack.c.bf16 %v555_v18, %v555_v18 }
 0x15d   : > { %562 = vst.msk [vmem:[%s474_s26] sm:$0xf] %vm561_vm1, %v559_v19  ;;  %v572_v23 = vunpack.c.l.b16 %v559_v19 }
 0x160   : > { %v556_v20 = vpop.f32.mrf.mxu1 }
 0x161   : > { %v557_v21 = vadd.f32 %v988_v16, %v556_v20 }
 0x163   : > { %v560_v22 = vpack.c.bf16 %v557_v21, %v557_v21 }
 0x165   : > { %563 = vst.msk [vmem:[%s474_s26 + $0x4] sm:$0xf] %vm561_vm1, %v560_v22  ;;  %v573_v24 = vunpack.c.l.b16 %v560_v22 }
 0x167   : > { %v574_v25 = vpack.c.b16 %v573_v24, %v572_v23 }
 0x169   : > { %860 = vmatmul.msk.bf16.vlgmr.msra.gmra.mxu2 %vm581_vm2, %v574_v25 }
 0x1ec   : > { %v594_v28 = vpop.f32.mrf.mxu2 }
 0x1ed   : > { %v595_v30 = vadd.f32 %v989_v29, %v594_v28 }
 0x1ef   : > { %v599_v33 = vmax.f32 %v595_v30, 0.0 }
 0x1f4   : > { %v596_v31 = vpop.f32.mrf.mxu2 }
 0x1f5   : > { %v597_v32 = vadd.f32 %v989_v29, %v596_v31 }
 0x1f7   : > { %v600_v34 = vmax.f32 %v597_v32, 0.0 }
 0x1f9   : > { %v601_v35 = vpack.c.bf16 %v600_v34, %v599_v33 }
 0x1fb   : > { %869 = vmatmul.msk.bf16.vlgmr.msra.gmra.mxu3 %vm501_vm0, %v601_v35 }
 0x27e   : > { %v634_v37 = vpop.f32.mrf.mxu3 }
 0x27f   : > { %v635_v38 = vadd.f32 %v990_v36, %v634_v37 }
 0x281   : > { %991 = vtanh.f32 %v635_v38 }
 0x286   : > { %v636_v39 = vpop.f32.mrf.mxu3 }
 0x287   : > { %v992_v40 = vpop.eup %991  ;;  %v637_v41 = vadd.f32 %v990_v36, %v636_v39 }
 0x288   : > { %v641_v42 = vpack.c.bf16 %v992_v40, %v992_v40 }
 0x289   : > { %993 = vtanh.f32 %v637_v41 }
 0x28a   : > { %644 = vst.msk [vmem:[%s468_s3] sm:$0xf] %vm643_vm3, %v641_v42 }
 0x28f   : > { %v994_v43 = vpop.eup %993 }
 0x290   : > { %v642_v44 = vpack.c.bf16 %v994_v43, %v994_v43 }
 0x292   : > { %645 = vst.msk [vmem:[%s468_s3 + $0x4] sm:$0xf] %vm643_vm3, %v642_v44 }
 0x293   : > { %1202 = shalt.err (!%p1199_p10)
}
 0x294   : > { %s1264_s28 = smov 64   ;;  %s1265_s12 = smov 4  }
 0x295   : > { %906 = dma.vmem_to_hbm [thread:$0]  (%p1411_p0), %s669_s21, 128, %s671_s27, %s652_s20, %s1264_s28, %s1264_s28, %s1265_s12  }
 0x296 PF: > { %s693_s29 = sand.u32 1, %s1241_s13   ;;  %p1542_p11 = scmp.ge.s32.totalorder %s1253_s16, 2 }
 0x297   : > { %s694_s5 = scalar_lea.sflag [#allocation4], %s693_s29 }
 0x298   : > { %p929_p12 = pnand %p1542_p11, %p1417_p6 }
 0x29a   : > { %p930_p2 = pneg %p929_p12 }
 0x29c   : > { %1236 = dma.done.wait (%p930_p2), %s694_s5, 128  }
 0x29d   : > { %1238 = vsyncadd (%p930_p2), %s694_s5, 4294967168  ;;  %p27_p4 = scmp.ge.s32.totalorder %s1387_s22, 4   ;;  %s1543_s13 = smov %s1245_s14 }
 0x29e   : > { %s1544_s14 = smov %s1249_s15  ;;  %s1545_s15 = smov %s1399_s25 }
 0x29f   : > { %s1546_s16 = smov %s1387_s22  ;;  %29 = sbr.rel (!%p27_p4) target bundleno = 14 (0xe), region = 133 }
 0x2a4   :  { %700 = vsyncpa [#allocation3], 1 }
 0x2a5   :  { %702 = vsyncpa [#allocation3 + $0x1], 1 }
 0x2a6   :  { %703 = vsyncpa [#allocation6], 1 }
 0x2a7   :  { %704 = vsyncpa [#allocation9], 1 }
 0x2a8   :  { %705 = vsyncpa [#allocation12], 1 }
 0x2a9   :  { %706 = vsyncpa [#allocation4], 1 }
 0x2aa   :  { %708 = vsyncpa [#allocation4 + $0x1], 1 }

</bundles_post_ra>
